<compile_context>
chip_gen: v7x
topology: tpu7x:2x2x1
jax: 0.10.0
libtpu: 0.0.40
codegen_flags: <defaults>
</compile_context>

<pallas_src>
import math

import jax
import jax.numpy as jnp
from jax.experimental import pallas as pl
from jax.experimental.pallas import tpu as pltpu

NO_RESIDUALS = 1          # matches DNN(no_residuals=1)
IN_FEATURES = 358
NUM_CLASSES = 4
DEFAULT_TILE_B = 2048


def _round_up(n, m):
    return (n + m - 1) // m * m


def _choose_tiling(batch, max_tile=DEFAULT_TILE_B):
    """Pick (tile_b, num_tiles, pad_b).

    - tile_b is a multiple of 8 (sublane tiling of the (tile_b, 358) f32 x block)
    - >= 2 grid steps when the batch is big enough, so the "parallel" batch axis
      actually shards across v7x's two TensorCores
    - pad_b - batch < tile_b (no round_up-to-DEFAULT_TILE_B padding waste)
    """
    num_tiles = max(pl.cdiv(batch, max_tile), 2 if batch >= 16 else 1)
    tile_b = _round_up(pl.cdiv(batch, num_tiles), 8)
    num_tiles = pl.cdiv(batch, tile_b)
    return tile_b, num_tiles, num_tiles * tile_b


def dnn_kernel(x_ref,
               w1_ref, b1_ref,
               w2_ref, b2_ref,
               w3_ref, b3_ref,
               w4_ref, b4_ref,
               w5_ref, b5_ref,
               out_ref):
    """Forward for one (tile_b, 358) batch tile: 5 linears + ReLU + softmax.

    x arrives as raw f32 (no wrapper-side pad/cast HBM pass) and is cast to
    bf16 in-kernel for the MXU; accumulation / bias / ReLU / softmax are f32.
    """

    def linear(h_bf16, w_ref, b_ref):
        # bias read exactly once per layer; MXU accumulates in f32
        return jnp.dot(h_bf16, w_ref[...],
                       preferred_element_type=jnp.float32) + b_ref[...]

    x_bf16 = x_ref[...].astype(jnp.bfloat16)                               # (T, 358)
    h = jnp.maximum(linear(x_bf16, w1_ref, b1_ref), 0.0)                   # (T, 128)
    h = jnp.maximum(linear(h.astype(jnp.bfloat16), w2_ref, b2_ref), 0.0)   # (T, 64)
    h = jnp.maximum(linear(h.astype(jnp.bfloat16), w3_ref, b3_ref), 0.0)   # (T, 32)
    # torch.flatten(start_dim=1): identity for no_residuals=1 (already (T, 32))
    h = jnp.maximum(linear(h.astype(jnp.bfloat16), w4_ref, b4_ref), 0.0)   # (T, 16)
    logits = linear(h.astype(jnp.bfloat16), w5_ref, b5_ref)                # (T, 4)

    # numerically stable, EXACT softmax along dim=1 (compute has slack here)
    m = jnp.max(logits, axis=1, keepdims=True)
    e = jnp.exp(logits - m)
    out_ref[...] = (e / jnp.sum(e, axis=1, keepdims=True)).astype(out_ref.dtype)


def dnn_forward(x, params, max_tile=DEFAULT_TILE_B):
    """x: (B, 358) float.  params: name -> (W[in, out] bf16, b[1, out] f32)."""
    B = x.shape[0]
    assert x.shape[1] == IN_FEATURES
    x = x.astype(jnp.float32)

    tile_b, num_tiles, pad_b = _choose_tiling(B, max_tile)
    if pad_b != B:
        # only the ragged tail (< tile_b rows) is padded; the bulk of x streams raw
        x = jnp.pad(x, ((0, pad_b - B), (0, 0)))

    flat_args = [x]
    weight_specs = []
    for name in ("linear1", "linear2", "linear3", "linear4", "linear5"):
        w, b = params[name]
        flat_args += [w, b]
        # constant index_map -> weights/biases stay VMEM-resident across the grid
        weight_specs += [
            pl.BlockSpec(w.shape, lambda i: (0, 0)),
            pl.BlockSpec(b.shape, lambda i: (0, 0)),
        ]

    weight_bytes = sum(int(a.size) * int(a.dtype.itemsize) for a in flat_args[1:])
    cost = pl.CostEstimate(
        flops=2 * pad_b * (IN_FEATURES * 128 + 128 * 64 + 64 * 32
                           + 32 * 16 + 16 * NUM_CLASSES),
        transcendentals=pad_b * NUM_CLASSES,   # exp per logit
        bytes_accessed=pad_b * (IN_FEATURES * 4 + NUM_CLASSES * 4) + weight_bytes,
    )

    out = pl.pallas_call(
        dnn_kernel,
        out_shape=jax.ShapeDtypeStruct((pad_b, NUM_CLASSES), jnp.float32),
        grid=(num_tiles,),
        in_specs=[pl.BlockSpec((tile_b, IN_FEATURES), lambda i: (i, 0))] + weight_specs,
        out_specs=pl.BlockSpec((tile_b, NUM_CLASSES), lambda i: (i, 0)),
        compiler_params=pltpu.CompilerParams(
            dimension_semantics=("parallel",),
            vmem_limit_bytes=32 * 1024 * 1024,
        ),
        cost_estimate=cost,
    )(*flat_args)
    return out[:B]


def init_params(key):
    """Deterministic init mimicking nn.Linear.reset_parameters():
    weight, bias ~ U(-1/sqrt(fan_in), 1/sqrt(fan_in)).

    Returns:
      params_kernel: W as (in, out) bf16, b as (1, out) f32
      params_ref:    f32 copies for the pure-JAX reference
    """
    dims = [
        ("linear1", IN_FEATURES, 128),
        ("linear2", 128, 64),
        ("linear3", 64, 32),
        ("linear4", NO_RESIDUALS * 32, 16),
        ("linear5", 16, NUM_CLASSES),
    ]
    params_kernel, params_ref = {}, {}
    for name, fan_in, fan_out in dims:
        key, kw, kb = jax.random.split(key, 3)
        bound = 1.0 / math.sqrt(fan_in)
        w = jax.random.uniform(kw, (fan_in, fan_out), jnp.float32, -bound, bound)
        b = jax.random.uniform(kb, (1, fan_out), jnp.float32, -bound, bound)
        params_ref[name] = (w, b)
        params_kernel[name] = (w.astype(jnp.bfloat16), b)
    return params_kernel, params_ref


def ref_forward(x, params_ref):
    """Pure-JAX f32 reference matching the PyTorch module."""
    h = x
    for name in ("linear1", "linear2", "linear3", "linear4"):
        w, b = params_ref[name]
        h = jnp.maximum(h @ w + b, 0.0)
    w, b = params_ref["linear5"]
    return jax.nn.softmax(h @ w + b, axis=1)


if __name__ == "__main__":
    key = jax.random.PRNGKey(0)
    key, kx = jax.random.split(key)

    B = 8
    x = jax.random.normal(kx, (B, IN_FEATURES), dtype=jnp.float32)
    params_kernel, params_ref = init_params(key)

    out = dnn_forward(x, params_kernel)
    out = jax.block_until_ready(out)

    assert out.shape == (B, NUM_CLASSES)

    # exact softmax normalization -> rows sum to 1 tightly
    row_sums = jnp.sum(out, axis=1)
    assert bool(jnp.allclose(row_sums, 1.0, atol=1e-3)), row_sums

    # parity with f32 reference (bf16 weights/activations -> loose tolerance)
    ref = ref_forward(x, params_ref)
    assert bool(jnp.allclose(out, ref, atol=5e-2)), jnp.max(jnp.abs(out - ref))

    print("KERNEL_OK")
</pallas_src>

<mosaic_0001>
module attributes {stable_mosaic.version = 11 : i64} {
  func.func @dnn_kernel(%arg0: i32, %arg1: memref<8x358xf32, #tpu.memory_space<vmem>>, %arg2: memref<358x128xbf16, #tpu.memory_space<vmem>>, %arg3: memref<1x128xf32, #tpu.memory_space<vmem>>, %arg4: memref<128x64xbf16, #tpu.memory_space<vmem>>, %arg5: memref<1x64xf32, #tpu.memory_space<vmem>>, %arg6: memref<64x32xbf16, #tpu.memory_space<vmem>>, %arg7: memref<1x32xf32, #tpu.memory_space<vmem>>, %arg8: memref<32x16xbf16, #tpu.memory_space<vmem>>, %arg9: memref<1x16xf32, #tpu.memory_space<vmem>>, %arg10: memref<16x4xbf16, #tpu.memory_space<vmem>>, %arg11: memref<1x4xf32, #tpu.memory_space<vmem>>, %arg12: memref<8x4xf32, #tpu.memory_space<vmem>>) attributes {dimension_semantics = [#tpu.dimension_semantics<parallel>], iteration_bounds = array<i64: 1>, scalar_prefetch = 0 : i64, scratch_operands = 0 : i64, tpu.core_type = #tpu.core_type<tc>, window_params = [{transform_indices = @transform_0, window_bounds = array<i64: 8, 358>}, {pipeline_mode = #tpu.pipeline_mode<synchronous>, transform_indices = @transform_1, window_bounds = array<i64: 358, 128>}, {pipeline_mode = #tpu.pipeline_mode<synchronous>, transform_indices = @transform_2, window_bounds = array<i64: 1, 128>}, {pipeline_mode = #tpu.pipeline_mode<synchronous>, transform_indices = @transform_3, window_bounds = array<i64: 128, 64>}, {pipeline_mode = #tpu.pipeline_mode<synchronous>, transform_indices = @transform_4, window_bounds = array<i64: 1, 64>}, {pipeline_mode = #tpu.pipeline_mode<synchronous>, transform_indices = @transform_5, window_bounds = array<i64: 64, 32>}, {pipeline_mode = #tpu.pipeline_mode<synchronous>, transform_indices = @transform_6, window_bounds = array<i64: 1, 32>}, {pipeline_mode = #tpu.pipeline_mode<synchronous>, transform_indices = @transform_7, window_bounds = array<i64: 32, 16>}, {pipeline_mode = #tpu.pipeline_mode<synchronous>, transform_indices = @transform_8, window_bounds = array<i64: 1, 16>}, {pipeline_mode = #tpu.pipeline_mode<synchronous>, transform_indices = @transform_9, window_bounds = array<i64: 16, 4>}, {pipeline_mode = #tpu.pipeline_mode<synchronous>, transform_indices = @transform_10, window_bounds = array<i64: 1, 4>}, {transform_indices = @transform_11, window_bounds = array<i64: 8, 4>}]} {
    %c0 = arith.constant 0 : index
    %c0_0 = arith.constant 0 : index
    %0 = vector.load %arg1[%c0, %c0_0] : memref<8x358xf32, #tpu.memory_space<vmem>>, vector<8x358xf32>
    %1 = arith.truncf %0 : vector<8x358xf32> to vector<8x358xbf16>
    %c0_1 = arith.constant 0 : index
    %c0_2 = arith.constant 0 : index
    %2 = vector.load %arg2[%c0_1, %c0_2] : memref<358x128xbf16, #tpu.memory_space<vmem>>, vector<358x128xbf16>
    %cst = arith.constant dense<0.000000e+00> : vector<8x128xf32>
    %3 = tpu.matmul %1, %2, %cst {dimension_numbers = #tpu.dot_dimension_numbers<[1], [0], [0], [1], [0, 0, 1, 1], [], []>} : vector<8x358xbf16>, vector<358x128xbf16>, vector<8x128xf32> -> vector<8x128xf32>
    %c0_3 = arith.constant 0 : index
    %c0_4 = arith.constant 0 : index
    %4 = vector.load %arg3[%c0_3, %c0_4] : memref<1x128xf32, #tpu.memory_space<vmem>>, vector<1x128xf32>
    %5 = vector.broadcast %4 : vector<1x128xf32> to vector<8x128xf32>
    %6 = arith.addf %3, %5 : vector<8x128xf32>
    %cst_5 = arith.constant 0.000000e+00 : f32
    %7 = vector.broadcast %cst_5 : f32 to vector<8x128xf32>
    %8 = arith.maximumf %6, %7 : vector<8x128xf32>
    %9 = arith.truncf %8 : vector<8x128xf32> to vector<8x128xbf16>
    %c0_6 = arith.constant 0 : index
    %c0_7 = arith.constant 0 : index
    %10 = vector.load %arg4[%c0_6, %c0_7] : memref<128x64xbf16, #tpu.memory_space<vmem>>, vector<128x64xbf16>
    %cst_8 = arith.constant dense<0.000000e+00> : vector<8x64xf32>
    %11 = tpu.matmul %9, %10, %cst_8 {dimension_numbers = #tpu.dot_dimension_numbers<[1], [0], [0], [1], [0, 0, 1, 1], [], []>} : vector<8x128xbf16>, vector<128x64xbf16>, vector<8x64xf32> -> vector<8x64xf32>
    %c0_9 = arith.constant 0 : index
    %c0_10 = arith.constant 0 : index
    %12 = vector.load %arg5[%c0_9, %c0_10] : memref<1x64xf32, #tpu.memory_space<vmem>>, vector<1x64xf32>
    %13 = vector.broadcast %12 : vector<1x64xf32> to vector<8x64xf32>
    %14 = arith.addf %11, %13 : vector<8x64xf32>
    %cst_11 = arith.constant 0.000000e+00 : f32
    %15 = vector.broadcast %cst_11 : f32 to vector<8x64xf32>
    %16 = arith.maximumf %14, %15 : vector<8x64xf32>
    %17 = arith.truncf %16 : vector<8x64xf32> to vector<8x64xbf16>
    %c0_12 = arith.constant 0 : index
    %c0_13 = arith.constant 0 : index
    %18 = vector.load %arg6[%c0_12, %c0_13] : memref<64x32xbf16, #tpu.memory_space<vmem>>, vector<64x32xbf16>
    %cst_14 = arith.constant dense<0.000000e+00> : vector<8x32xf32>
    %19 = tpu.matmul %17, %18, %cst_14 {dimension_numbers = #tpu.dot_dimension_numbers<[1], [0], [0], [1], [0, 0, 1, 1], [], []>} : vector<8x64xbf16>, vector<64x32xbf16>, vector<8x32xf32> -> vector<8x32xf32>
    %c0_15 = arith.constant 0 : index
    %c0_16 = arith.constant 0 : index
    %20 = vector.load %arg7[%c0_15, %c0_16] : memref<1x32xf32, #tpu.memory_space<vmem>>, vector<1x32xf32>
    %21 = vector.broadcast %20 : vector<1x32xf32> to vector<8x32xf32>
    %22 = arith.addf %19, %21 : vector<8x32xf32>
    %cst_17 = arith.constant 0.000000e+00 : f32
    %23 = vector.broadcast %cst_17 : f32 to vector<8x32xf32>
    %24 = arith.maximumf %22, %23 : vector<8x32xf32>
    %25 = arith.truncf %24 : vector<8x32xf32> to vector<8x32xbf16>
    %c0_18 = arith.constant 0 : index
    %c0_19 = arith.constant 0 : index
    %26 = vector.load %arg8[%c0_18, %c0_19] : memref<32x16xbf16, #tpu.memory_space<vmem>>, vector<32x16xbf16>
    %cst_20 = arith.constant dense<0.000000e+00> : vector<8x16xf32>
    %27 = tpu.matmul %25, %26, %cst_20 {dimension_numbers = #tpu.dot_dimension_numbers<[1], [0], [0], [1], [0, 0, 1, 1], [], []>} : vector<8x32xbf16>, vector<32x16xbf16>, vector<8x16xf32> -> vector<8x16xf32>
    %c0_21 = arith.constant 0 : index
    %c0_22 = arith.constant 0 : index
    %28 = vector.load %arg9[%c0_21, %c0_22] : memref<1x16xf32, #tpu.memory_space<vmem>>, vector<1x16xf32>
    %29 = vector.broadcast %28 : vector<1x16xf32> to vector<8x16xf32>
    %30 = arith.addf %27, %29 : vector<8x16xf32>
    %cst_23 = arith.constant 0.000000e+00 : f32
    %31 = vector.broadcast %cst_23 : f32 to vector<8x16xf32>
    %32 = arith.maximumf %30, %31 : vector<8x16xf32>
    %33 = arith.truncf %32 : vector<8x16xf32> to vector<8x16xbf16>
    %c0_24 = arith.constant 0 : index
    %c0_25 = arith.constant 0 : index
    %34 = vector.load %arg10[%c0_24, %c0_25] : memref<16x4xbf16, #tpu.memory_space<vmem>>, vector<16x4xbf16>
    %cst_26 = arith.constant dense<0.000000e+00> : vector<8x4xf32>
    %35 = tpu.matmul %33, %34, %cst_26 {dimension_numbers = #tpu.dot_dimension_numbers<[1], [0], [0], [1], [0, 0, 1, 1], [], []>} : vector<8x16xbf16>, vector<16x4xbf16>, vector<8x4xf32> -> vector<8x4xf32>
    %c0_27 = arith.constant 0 : index
    %c0_28 = arith.constant 0 : index
    %36 = vector.load %arg11[%c0_27, %c0_28] : memref<1x4xf32, #tpu.memory_space<vmem>>, vector<1x4xf32>
    %37 = vector.broadcast %36 : vector<1x4xf32> to vector<8x4xf32>
    %38 = arith.addf %35, %37 : vector<8x4xf32>
    %cst_29 = arith.constant dense<0xFF800000> : vector<8xf32>
    %39 = vector.multi_reduction <maximumf>, %38, %cst_29 [1] : vector<8x4xf32> to vector<8xf32>
    %40 = vector.shape_cast %39 : vector<8xf32> to vector<8x1xf32>
    %41 = vector.broadcast %40 : vector<8x1xf32> to vector<8x4xf32>
    %42 = arith.subf %38, %41 : vector<8x4xf32>
    %43 = math.exp %42 : vector<8x4xf32>
    %cst_30 = arith.constant dense<0.000000e+00> : vector<8xf32>
    %44 = vector.multi_reduction <add>, %43, %cst_30 [1] : vector<8x4xf32> to vector<8xf32>
    %45 = vector.shape_cast %44 : vector<8xf32> to vector<8x1xf32>
    %46 = vector.broadcast %45 : vector<8x1xf32> to vector<8x4xf32>
    %47 = arith.divf %43, %46 : vector<8x4xf32>
    %c0_31 = arith.constant 0 : index
    %c0_32 = arith.constant 0 : index
    %48 = vector.load %arg12[%c0_31, %c0_32] : memref<8x4xf32, #tpu.memory_space<vmem>>, vector<8x4xf32>
    tpu.vector_store %arg12[%c0_31, %c0_32], %47 {strides = array<i32>} : memref<8x4xf32, #tpu.memory_space<vmem>>, vector<8x4xf32>,
    return
  }
  func.func @transform_0(%arg0: i32) -> (i32, i32) {
    %c0_i32 = arith.constant 0 : i32
    %c0_i32_0 = arith.constant 0 : i32
    return %arg0, %c0_i32 : i32, i32
  }
  func.func @transform_1(%arg0: i32) -> (i32, i32) {
    %c0_i32 = arith.constant 0 : i32
    %c0_i32_0 = arith.constant 0 : i32
    %c0_i32_1 = arith.constant 0 : i32
    return %c0_i32, %c0_i32_0 : i32, i32
  }
  func.func @transform_2(%arg0: i32) -> (i32, i32) {
    %c0_i32 = arith.constant 0 : i32
    %c0_i32_0 = arith.constant 0 : i32
    %c0_i32_1 = arith.constant 0 : i32
    return %c0_i32, %c0_i32_0 : i32, i32
  }
  func.func @transform_3(%arg0: i32) -> (i32, i32) {
    %c0_i32 = arith.constant 0 : i32
    %c0_i32_0 = arith.constant 0 : i32
    %c0_i32_1 = arith.constant 0 : i32
    return %c0_i32, %c0_i32_0 : i32, i32
  }
  func.func @transform_4(%arg0: i32) -> (i32, i32) {
    %c0_i32 = arith.constant 0 : i32
    %c0_i32_0 = arith.constant 0 : i32
    %c0_i32_1 = arith.constant 0 : i32
    return %c0_i32, %c0_i32_0 : i32, i32
  }
  func.func @transform_5(%arg0: i32) -> (i32, i32) {
    %c0_i32 = arith.constant 0 : i32
    %c0_i32_0 = arith.constant 0 : i32
    %c0_i32_1 = arith.constant 0 : i32
    return %c0_i32, %c0_i32_0 : i32, i32
  }
  func.func @transform_6(%arg0: i32) -> (i32, i32) {
    %c0_i32 = arith.constant 0 : i32
    %c0_i32_0 = arith.constant 0 : i32
    %c0_i32_1 = arith.constant 0 : i32
    return %c0_i32, %c0_i32_0 : i32, i32
  }
  func.func @transform_7(%arg0: i32) -> (i32, i32) {
    %c0_i32 = arith.constant 0 : i32
    %c0_i32_0 = arith.constant 0 : i32
    %c0_i32_1 = arith.constant 0 : i32
    return %c0_i32, %c0_i32_0 : i32, i32
  }
  func.func @transform_8(%arg0: i32) -> (i32, i32) {
    %c0_i32 = arith.constant 0 : i32
    %c0_i32_0 = arith.constant 0 : i32
    %c0_i32_1 = arith.constant 0 : i32
    return %c0_i32, %c0_i32_0 : i32, i32
  }
  func.func @transform_9(%arg0: i32) -> (i32, i32) {
    %c0_i32 = arith.constant 0 : i32
    %c0_i32_0 = arith.constant 0 : i32
    %c0_i32_1 = arith.constant 0 : i32
    return %c0_i32, %c0_i32_0 : i32, i32
  }
  func.func @transform_10(%arg0: i32) -> (i32, i32) {
    %c0_i32 = arith.constant 0 : i32
    %c0_i32_0 = arith.constant 0 : i32
    %c0_i32_1 = arith.constant 0 : i32
    return %c0_i32, %c0_i32_0 : i32, i32
  }
  func.func @transform_11(%arg0: i32) -> (i32, i32) {
    %c0_i32 = arith.constant 0 : i32
    %c0_i32_0 = arith.constant 0 : i32
    return %arg0, %c0_i32 : i32, i32
  }
}

</mosaic_0001>

<bundles_post_ra>
// kernel: tpu_custom_call.1
= control target key start
LH: loop header
LB: loop body
LE: loop exit
PB: predicated region body
PF: predicated region fallthrough
CT: control target
= control target key end

     0   :  { %16 = vsyncpa [#allocation3], 0  ;;  %s1289_s0 = inlined_call_operand.hbm [shape: f32[8,358], index: 0, kind: input, shape index: {}]   ;;  %s1290_s1 = inlined_call_operand.vmem [shape: bf16[358,128], index: 1, kind: input, shape index: {}]   ;;  %s1291_s2 = inlined_call_operand.hbm [shape: f32[1,128], index: 2, kind: input, shape index: {}]   ;;  %s1292_s3 = inlined_call_operand.vmem [shape: bf16[128,64], index: 3, kind: input, shape index: {}]   ;;  %s1293_s4 = inlined_call_operand.hbm [shape: f32[1,64], index: 4, kind: input, shape index: {}]   ;;  %s1294_s5 = inlined_call_operand.vmem [shape: bf16[64,32], index: 5, kind: input, shape index: {}]   ;;  %s1295_s6 = inlined_call_operand.hbm [shape: f32[1,32], index: 6, kind: input, shape index: {}]   ;;  %s1296_s7 = inlined_call_operand.vmem [shape: bf16[32,16], index: 7, kind: input, shape index: {}]   ;;  %s1297_s8 = inlined_call_operand.vmem [shape: f32[1,16], index: 8, kind: input, shape index: {}]   ;;  %s1298_s9 = inlined_call_operand.vmem [shape: bf16[16,4], index: 9, kind: input, shape index: {}]   ;;  %s1299_s10 = inlined_call_operand.vmem [shape: f32[1,4], index: 10, kind: input, shape index: {}]   ;;  %s1300_s11 = inlined_call_operand.vmem [shape: f32[8,4], index: 11, kind: output, shape index: {}]  }
   0x1   :  { %17 = vsyncpa [#allocation5], 0 }
   0x2   :  { %18 = vsyncpa [#allocation8], 0  ;;  %s1017_s17 = smov [#allocation4]   ;;  %s1018_s19 = smov [#allocation2]  }
   0x3   :  { %s37_s18 = sshll.u32 %s1017_s17, 4  ;;  %s25_s20 = sshll.u32 %s1018_s19, 4  ;;  %s38_s18 = int_to_ptr.vmem [resolvable:$true] %s37_s18  ;;  %s26_s20 = int_to_ptr.vmem [resolvable:$true] %s25_s20 }
   0x4   :  { %s923_s23 = scalar_lea.hbm %s1291_s2, 16 }
   0x5   :  { %p924_p0 = scmp.ne.s32.totalorder %s1291_s2, %s923_s23  ;;  %p927_p1 = scmp.lt.u32.totalorder %s923_s23, %s1291_s2 }
   0x7   :  { %p929_p2 = pnand %p927_p1, %p924_p0 }
   0x9   :  { %932 = shalt.err (!%p929_p2)
}
   0xa   :  { %s933_s28 = scalar_lea.vmem %s38_s18, 16  ;;  %s937_s29 = scalar_lea.vmem %s38_s18, 32 }
   0xb   :  { %p934_p3 = scmp.ne.s32.totalorder %s38_s18, %s933_s28  ;;  %p938_p4 = scmp.lt.s32.totalorder %s38_s18, %s38_s18 }
   0xc   :  { %p939_p5 = scmp.lt.s32.totalorder %s937_s29, %s933_s28 }
   0xe   :  { %p940_p6 = por %p939_p5, %p938_p4 }
  0x10   :  { %p941_p7 = pnand %p940_p6, %p934_p3 }
  0x12   :  { %944 = shalt.err (!%p941_p7)
}
  0x13   :  { %40 = dma.hbm_to_vmem [thread:$0]  %s1291_s2, 16, %s38_s18, [#allocation5]  }
  0x14   :  { %s945_s15 = scalar_lea.hbm %s1289_s0, 384 }
  0x15   :  { %p946_p8 = scmp.ne.s32.totalorder %s1289_s0, %s945_s15  ;;  %p949_p9 = scmp.lt.u32.totalorder %s945_s15, %s1289_s0 }
  0x17   :  { %p951_p10 = pnand %p949_p9, %p946_p8 }
  0x19   :  { %954 = shalt.err (!%p951_p10)
}
  0x1a   :  { %s955_s22 = scalar_lea.vmem %s26_s20, 384  ;;  %p960_p12 = scmp.lt.s32.totalorder %s26_s20, %s26_s20 }
  0x1b   :  { %p956_p11 = scmp.ne.s32.totalorder %s26_s20, %s955_s22  ;;  %p961_p13 = scmp.lt.s32.totalorder %s955_s22, %s955_s22 }
  0x1d   :  { %p962_p0 = por %p961_p13, %p960_p12 }
  0x1f   :  { %p963_p1 = pnand %p962_p0, %p956_p11 }
  0x21   :  { %966 = shalt.err (!%p963_p1)
}
  0x22   :  { %28 = dma.hbm_to_vmem [thread:$0]  %s1289_s0, 384, %s26_s20, [#allocation3]  }
  0x23   :  { %s1019_s23 = smov [#allocation6]   ;;  %s1020_s25 = smov [#allocation7]  }
  0x24   :  { %s49_s24 = sshll.u32 %s1019_s23, 4  ;;  %s61_s26 = sshll.u32 %s1020_s25, 4  ;;  %s50_s24 = int_to_ptr.vmem [resolvable:$true] %s49_s24  ;;  %s62_s26 = int_to_ptr.vmem [resolvable:$true] %s61_s26 }
  0x25   :  { %s967_s29 = scalar_lea.hbm %s1293_s4, 16 }
  0x26   :  { %p968_p2 = scmp.ne.s32.totalorder %s1293_s4, %s967_s29  ;;  %p971_p3 = scmp.lt.u32.totalorder %s967_s29, %s1293_s4 }
  0x28   :  { %p973_p4 = pnand %p971_p3, %p968_p2 }
  0x2a   :  { %976 = shalt.err (!%p973_p4)
}
  0x2b   :  { %s977_s0 = scalar_lea.vmem %s50_s24, 16  ;;  %s981_s20 = scalar_lea.vmem %s50_s24, 32 }
  0x2c   :  { %p978_p5 = scmp.ne.s32.totalorder %s50_s24, %s977_s0  ;;  %p982_p6 = scmp.lt.s32.totalorder %s50_s24, %s50_s24 }
  0x2d   :  { %p983_p7 = scmp.lt.s32.totalorder %s981_s20, %s977_s0 }
  0x2f   :  { %p984_p8 = por %p983_p7, %p982_p6 }
  0x31   :  { %p985_p9 = pnand %p984_p8, %p978_p5 }
  0x33   :  { %988 = shalt.err (!%p985_p9)
}
  0x34   :  { %52 = dma.hbm_to_vmem [thread:$0]  %s1293_s4, 16, %s50_s24, [#allocation5]  }
  0x35   :  { %s989_s21 = scalar_lea.hbm %s1295_s6, 16 }
  0x36   :  { %p990_p10 = scmp.ne.s32.totalorder %s1295_s6, %s989_s21  ;;  %p993_p11 = scmp.lt.u32.totalorder %s989_s21, %s1295_s6 }
  0x38   :  { %p995_p12 = pnand %p993_p11, %p990_p10 }
  0x3a   :  { %998 = shalt.err (!%p995_p12)
}
  0x3b   :  { %s999_s25 = scalar_lea.vmem %s62_s26, 16  ;;  %s1003_s27 = scalar_lea.vmem %s62_s26, 32 }
  0x3c   :  { %p1000_p13 = scmp.ne.s32.totalorder %s62_s26, %s999_s25  ;;  %p1004_p0 = scmp.lt.s32.totalorder %s62_s26, %s62_s26 }
  0x3d   :  { %p1005_p1 = scmp.lt.s32.totalorder %s1003_s27, %s999_s25 }
  0x3f   :  { %p1006_p2 = por %p1005_p1, %p1004_p0 }
  0x41   :  { %p1007_p3 = pnand %p1006_p2, %p1000_p13 }
  0x43   :  { %1010 = shalt.err (!%p1007_p3)
}
  0x44   :  { %64 = dma.hbm_to_vmem [thread:$0]  %s1295_s6, 16, %s62_s26, [#allocation8]  }
  0x45   :  { %1011 = dma.done.wait [#allocation3], 384  }
  0x46   :  { %1012 = vsyncadd [#allocation3], 4294966912 }
  0x47   :  { %1013 = dma.done.wait [#allocation5], 32  }
  0x48   :  { %1014 = vsyncadd [#allocation5], 4294967264 }
  0x49   :  { %1015 = dma.done.wait [#allocation8], 16  }
  0x4a   :  { %1016 = vsyncadd [#allocation8], 4294967280  ;;  %v1021_v0 = vmov 0.0   ;;  %vm1022_vm0 = vmmov 0   ;;  %v881_v1 = vld [vmem:[%s1290_s1 + $0x40] sm:$0xff]   ;;  %v883_v3 = vld [vmem:[%s1290_s1 + $0x48] sm:$0xff]  }
  0x4b   :  { %811 = vmatprep.subr.bf16.mxu1 %v1021_v0  ;;  %825 = vmatprep.mubr.msk.bf16.mxu1 %vm1022_vm0, %v1021_v0  ;;  %v882_v2 = vld [vmem:[%s1290_s1] sm:$0xff]   ;;  %v884_v4 = vld [vmem:[%s1290_s1 + $0x8] sm:$0xff]   ;;  %v886_v6 = vld [vmem:[%s1290_s1 + $0x50] sm:$0xff]   ;;  %vm283_vm1 = vcmask 1042432   ;;  %vm279_vm2 = vcmask 834560   ;;  %vm521_vm3 = vcmask 523264  }
  0x4c   :  { %762 = vmatprep.subr.bf16.mxu0 %v881_v1  ;;  %v885_v5 = vld [vmem:[%s1290_s1 + $0x80] sm:$0xff]   ;;  %v887_v7 = vld [vmem:[%s1290_s1 + $0x10] sm:$0xff]   ;;  %v888_v8 = vld [vmem:[%s1290_s1 + $0x88] sm:$0xff]   ;;  %vm590_vm4 = vcmask 261120   ;;  %vm651_vm5 = vcmask 130048   ;;  %vm695_vm6 = vcmask 31744  }
  0x4d   :  { %763 = vmatpush3.bf16.msra.mxu0 %v882_v2  ;;  %812 = vmatpush3.bf16.msra.mxu1 %v885_v5  ;;  %v889_v9 = vld [vmem:[%s1290_s1 + $0x58] sm:$0xff]   ;;  %v891_v10 = vld [vmem:[%s1290_s1 + $0x90] sm:$0xff]   ;;  %v892_v12 = vld [vmem:[%s1290_s1 + $0x60] sm:$0xff]  }
  0x4e   :  { %764 = vmatprep.subr.bf16.mxu0 %v883_v3  ;;  %813 = vmatprep.subr.bf16.mxu1 %v1021_v0  ;;  %v890_v11 = vld [vmem:[%s1290_s1 + $0x18] sm:$0xff]   ;;  %v893_v14 = vld [vmem:[%s1290_s1 + $0x20] sm:$0xff]   ;;  %v895_v15 = vld [vmem:[%s1290_s1 + $0x68] sm:$0xff]  }
  0x4f   :  { %v894_v13 = vld [vmem:[%s1290_s1 + $0x98] sm:$0xff]   ;;  %v897_v16 = vld [vmem:[%s1290_s1 + $0xa0] sm:$0xff]   ;;  %v896_v17 = vld [vmem:[%s1290_s1 + $0x28] sm:$0xff]  }
  0x50   :  { %v898_v18 = vld [vmem:[%s1290_s1 + $0x70] sm:$0xff]   ;;  %v900_v19 = vld [vmem:[%s1290_s1 + $0xa8] sm:$0xff]   ;;  %v901_v24 = vld [vmem:[%s1290_s1 + $0x78] sm:$0xff]  }
  0x51   :  { %765 = vmatpush3.bf16.msra.mxu0 %v884_v4  ;;  %814 = vmatpush3.bf16.msra.mxu1 %v888_v8  ;;  %v87_v20 = vld [vmem:[#allocation2 + $0x8] sm:$0xff]  ;;  %v899_v21 = vld [vmem:[%s1290_s1 + $0x30] sm:$0xff]   ;;  %v902_v25 = vld [vmem:[%s1290_s1 + $0x38] sm:$0xff]  }
  0x52   :  { %766 = vmatprep.subr.bf16.mxu0 %v886_v6  ;;  %815 = vmatprep.subr.bf16.mxu1 %v1021_v0  ;;  %v90_v22 = vpack.c.bf16 %v87_v20, %v87_v20  ;;  %v903_v23 = vld [vmem:[%s1290_s1 + $0xb0] ss:$0 sps:$4 sm:$0x77]   ;;  %v86_v28 = vld [vmem:[#allocation2] sm:$0xff]  ;;  %v905_v32 = vld [vmem:[%s1292_s3 + $0x8] sm:$0xff]  }
  0x53   :  { %v88_v26 = vld [vmem:[#allocation2 + $0x10] sm:$0xff]  ;;  %v285_v27 = vsel %vm283_vm1, %v903_v23, 0  ;;  %v904_v29 = vld [vmem:[%s1292_s3] sm:$0xff]   ;;  %v89_v31 = vpack.c.bf16 %v86_v28, %v86_v28  ;;  %v907_v34 = vld [vmem:[%s1292_s3 + $0x18] sm:$0xff]  }
  0x54   :  { %319 = vmatprep.mubr.bf16.mxu0 %v90_v22  ;;  %v91_v30 = vpack.c.bf16 %v88_v26, %v88_v26  ;;  %v906_v33 = vld [vmem:[%s1292_s3 + $0x10] sm:$0xff]   ;;  %v908_v35 = vld [vmem:[%s1292_s3 + $0x20] sm:$0xff]   ;;  %v909_v36 = vld [vmem:[%s1292_s3 + $0x28] sm:$0xff]  }
  0x55   :  { %767 = vmatpush3.bf16.msra.mxu0 %v887_v7  ;;  %816 = vmatpush3.bf16.msra.mxu1 %v891_v10  ;;  %v910_v37 = vld [vmem:[%s1292_s3 + $0x30] sm:$0xff]   ;;  %v911_v38 = vld [vmem:[%s1292_s3 + $0x38] sm:$0xff]   ;;  %v912_v39 = vld [vmem:[%s1294_s5] sm:$0xff]  }
  0x56   :  { %768 = vmatprep.subr.bf16.mxu0 %v889_v9  ;;  %817 = vmatprep.subr.bf16.mxu1 %v1021_v0  ;;  %v913_v40 = vld [vmem:[%s1294_s5 + $0x8] sm:$0xff]   ;;  %v715_v45 = vld [vmem:[#allocation4] ss:$0 sm:$0xff]  ;;  %v914_v55 = vld [vmem:[%s1294_s5 + $0x10] sm:$0xff]  }
  0x57   :  { %v915_v56 = vld [vmem:[%s1294_s5 + $0x18] sm:$0xff]   ;;  %v916_v1 = vld [vmem:[%s1296_s7] sm:$0xff]   ;;  %v917_v3 = vld [vmem:[%s1296_s7 + $0x8] sm:$0xff]  }
  0x58   :  { %v740_v57 = vld [vmem:[#allocation6] ss:$0 sm:$0xff]  ;;  %v749_v4 = vld [vmem:[#allocation7] ss:$0 sm:$0xff] }
  0x59   :  { %769 = vmatpush3.bf16.msra.mxu0 %v890_v11  ;;  %818 = vmatpush3.bf16.msra.mxu1 %v894_v13  ;;  %v918_v11 = vld [vmem:[%s1298_s9] sm:$0xff]  }
  0x5a   :  { %770 = vmatprep.subr.bf16.mxu0 %v892_v12  ;;  %819 = vmatprep.subr.bf16.mxu1 %v1021_v0  ;;  %v755_v13 = vld [vmem:[%s1297_s8] ss:$0 sm:$0xff] }
  0x5d   :  { %771 = vmatpush3.bf16.msra.mxu0 %v893_v14  ;;  %820 = vmatpush3.bf16.msra.mxu1 %v897_v16 }
  0x5e   :  { %772 = vmatprep.subr.bf16.mxu0 %v895_v15  ;;  %821 = vmatprep.subr.bf16.mxu1 %v1021_v0 }
  0x61   :  { %773 = vmatpush3.bf16.msra.mxu0 %v896_v17  ;;  %822 = vmatpush3.bf16.msra.mxu1 %v900_v19 }
  0x62   :  { %774 = vmatprep.subr.bf16.mxu0 %v898_v18  ;;  %823 = vmatprep.subr.bf16.mxu1 %v1021_v0 }
  0x65   :  { %775 = vmatpush3.bf16.msra.mxu0 %v899_v21  ;;  %824 = vmatpush3.bf16.msra.mxu1 %v285_v27  ;;  %v759_v21 = vld [vmem:[%s1299_s10] ss:$0 sm:$0xff] }
  0x66   :  { %776 = vmatprep.subr.bf16.mxu0 %v901_v24  ;;  %829 = vmatprep.subr.bf16.mxu1 %v1021_v0 }
  0x68   :  { %826 = vmatmul.mubr.msk.bf16.vlgmr.msra.gmra.mrb[0].mxu1 %vm279_vm2, %v91_v30 }
  0x69   :  { %777 = vmatpush3.bf16.msra.mxu0 %v902_v25  ;;  %830 = vmatpush3.bf16.msra.mxu1 %v904_v29 }
  0x6a   :  { %849 = vmatprep.subr.bf16.mxu0 %v1021_v0  ;;  %831 = vmatprep.subr.bf16.mxu1 %v1021_v0 }
  0x6b   :  { %845 = vmatprep.mubr.msk.bf16.mxu1 %vm1022_vm0, %v1021_v0 }
  0x6c   :  { %320 = vmatmul.mubr.bf16.vlgmr.msra.gmra.mrb[0].mxu0 %v89_v31 }
  0x6d   :  { %857 = vmatprep.mubr.msk.bf16.mxu0 %vm1022_vm0, %v1021_v0  ;;  %832 = vmatpush3.bf16.msra.mxu1 %v905_v32 }
  0x6e   :  { %833 = vmatprep.subr.bf16.mxu1 %v1021_v0  ;;  %850 = vmatpush3.bf16.msra.mxu0 %v912_v39 }
  0x6f   :  { %851 = vmatprep.subr.bf16.mxu0 %v1021_v0 }
  0x71   :  { %834 = vmatpush3.bf16.msra.mxu1 %v906_v33 }
  0x72   :  { %835 = vmatprep.subr.bf16.mxu1 %v1021_v0  ;;  %852 = vmatpush3.bf16.msra.mxu0 %v913_v40 }
  0x73   :  { %853 = vmatprep.subr.bf16.mxu0 %v1021_v0 }
  0x75   :  { %836 = vmatpush3.bf16.msra.mxu1 %v907_v34 }
  0x76   :  { %837 = vmatprep.subr.bf16.mxu1 %v1021_v0  ;;  %854 = vmatpush3.bf16.msra.mxu0 %v914_v55 }
  0x77   :  { %855 = vmatprep.subr.bf16.mxu0 %v1021_v0 }
  0x79   :  { %838 = vmatpush3.bf16.msra.mxu1 %v908_v35 }
  0x7a   :  { %839 = vmatprep.subr.bf16.mxu1 %v1021_v0  ;;  %856 = vmatpush3.bf16.msra.mxu0 %v915_v56 }
  0x7b   :  { %861 = vmatprep.subr.bf16.mxu0 %v1021_v0 }
  0x7d   :  { %840 = vmatpush3.bf16.msra.mxu1 %v909_v36 }
  0x7e   :  { %841 = vmatprep.subr.bf16.mxu1 %v1021_v0 }
  0x81   :  { %842 = vmatpush3.bf16.msra.mxu1 %v910_v37 }
  0x82   :  { %843 = vmatprep.subr.bf16.mxu1 %v1021_v0 }
  0x85   :  { %844 = vmatpush3.bf16.msra.mxu1 %v911_v38 }
 0x13b   :  { %v361_v41 = vpop.f32.mrb[0].mxu1 }
 0x13c   :  { %v827_v43 = vpop.f32.mrb[1].mxu1 }
 0x13d   :  { %v364_v46 = vpop.f32.mrb[2].mxu1 }
 0x13e   :  { %v828_v49 = vpop.f32.mrb[3].mxu1 }
 0x13f   :  { %v778_v42 = vpop.f32.mrb[0].mxu0 }
 0x140   :  { %v779_v44 = vpop.f32.mrb[1].mxu0 }
 0x141   :  { %v780_v47 = vadd.f32 %v779_v44, %v778_v42  ;;  %v781_v48 = vpop.f32.mrb[2].mxu0 }
 0x142   :  { %v782_v50 = vpop.f32.mrb[3].mxu0 }
 0x143   :  { %v322_v51 = vadd.f32 %v780_v47, %v715_v45 }
 0x145   :  { %v362_v52 = vadd.f32 %v361_v41, %v322_v51 }
 0x147   :  { %v367_v53 = vmax.f32 %v362_v52, 0.0 }
 0x149   :  { %v368_v54 = vpack.c.bf16 %v367_v53, %v367_v53 }
 0x14b   :  { %846 = vmatmul.mubr.bf16.vlgmr.msra.gmra.mrb[4].mxu1 %v368_v54 }
 0x21e   :  { %v474_v58 = vpop.f32.mrb[4].mxu1 }
 0x21f   :  { %v475_v59 = vadd.f32 %v740_v57, %v474_v58  ;;  %v847_v60 = vpop.f32.mrb[5].mxu1 }
 0x220   :  { %v477_v61 = vpop.f32.mrb[6].mxu1 }
 0x221   :  { %v480_v62 = vmax.f32 %v475_v59, 0.0  ;;  %v848_v63 = vpop.f32.mrb[7].mxu1 }
 0x223   :  { %v481_v2 = vpack.c.bf16 %v480_v62, %v480_v62 }
 0x225   :  { %858 = vmatmul.mubr.msk.bf16.vlgmr.msra.gmra.mrb[4].mxu0 %vm521_vm3, %v481_v2 }
 0x226   :  { %862 = vmatpush3.bf16.msra.mxu0 %v916_v1  ;;  %865 = vmatprep.mubr.msk.bf16.mxu0 %vm1022_vm0, %v1021_v0 }
 0x227   :  { %863 = vmatprep.subr.bf16.mxu0 %v1021_v0 }
 0x22a   :  { %864 = vmatpush3.bf16.msra.mxu0 %v917_v3 }
 0x22b   :  { %869 = vmatprep.subr.bf16.mxu0 %v1021_v0 }
 0x2f8   :  { %v559_v5 = vpop.f32.mrb[4].mxu0 }
 0x2f9   :  { %v560_v6 = vadd.f32 %v749_v4, %v559_v5  ;;  %v859_v7 = vpop.f32.mrb[5].mxu0 }
 0x2fa   :  { %v562_v8 = vpop.f32.mrb[6].mxu0 }
 0x2fb   :  { %v565_v9 = vmax.f32 %v560_v6, 0.0  ;;  %v860_v10 = vpop.f32.mrb[7].mxu0 }
 0x2fd   :  { %v566_v12 = vpack.c.bf16 %v565_v9, %v565_v9 }
 0x2ff   :  { %866 = vmatmul.mubr.msk.bf16.vlgmr.msra.gmra.mrb[8].mxu0 %vm590_vm4, %v566_v12 }
 0x300   :  { %870 = vmatpush3.bf16.msra.mxu0 %v918_v11  ;;  %871 = vmatprep.mubr.msk.bf16.mxu0 %vm1022_vm0, %v1021_v0 }
 0x3d2   :  { %v628_v14 = vpop.f32.mrb[8].mxu0 }
 0x3d3   :  { %v629_v15 = vadd.f32 %v755_v13, %v628_v14  ;;  %v867_v16 = vpop.f32.mrb[9].mxu0 }
 0x3d4   :  { %v631_v17 = vpop.f32.mrb[10].mxu0 }
 0x3d5   :  { %v634_v18 = vmax.f32 %v629_v15, 0.0  ;;  %v868_v19 = vpop.f32.mrb[11].mxu0 }
 0x3d7   :  { %v635_v20 = vpack.c.bf16 %v634_v18, %v634_v18 }
 0x3d9   :  { %872 = vmatmul.mubr.msk.bf16.vlgmr.msra.gmra.mrb[12].mxu0 %vm651_vm5, %v635_v20 }
 0x4ac   :  { %v689_v22 = vpop.f32.mrb[12].mxu0 }
 0x4ad   :  { %v690_v0 = vadd.f32 %v759_v21, %v689_v22  ;;  %v873_v23 = vpop.f32.mrb[13].mxu0 }
 0x4ae   :  { %v692_v24 = vpop.f32.mrb[14].mxu0 }
 0x4af   :  { %v874_v25 = vpop.f32.mrb[15].mxu0  ;;  %v696_v26 = vsel %vm695_vm6, %v690_v0, -inf }
 0x4b0   :  { %697 = vmax.xlane.f32.xlu0 %v696_v26 }
 0x53d   :  { %v698_v27 = vpop.xlane.xlu0 %697 }
 0x53e   :  { %v699_v28 = vsub.f32 %v690_v0, %v698_v27 }
 0x540   :  { %v700_v29 = vmul.f32 1.442695, %v699_v28 }
 0x542   :  { %919 = vpow2.f32 %v700_v29 }
 0x54c   :  { %v920_v30 = vpop.eup %919 }
 0x54d   :  { %v702_v31 = vsel %vm695_vm6, %v920_v30, 0.0 }
 0x54e   :  { %703 = vadd.xlane.f32.xlu0 %v702_v31 }
 0x5db   :  { %v704_v32 = vpop.xlane.xlu0 %703 }
 0x5dc   :  { %921 = vrcp.f32 %v704_v32 }
 0x5e6   :  { %v922_v33 = vpop.eup %921 }
 0x5e7   :  { %v706_v34 = vmul.f32 %v922_v33, %v920_v30 }
 0x5e9   :  { %707 = vst.msk [vmem:[%s1300_s11] sm:$0xff] %vm695_vm6, %v706_v34 }
 0x5ea   :  { %712 = vsyncpa [#allocation3], 1 }
 0x5eb   :  { %713 = vsyncpa [#allocation5], 1 }
 0x5ec   :  { %714 = vsyncpa [#allocation8], 1 }

</bundles_post_ra>
